<compile_context>
chip_gen: v6e
topology: v6e:2x2x1
jax: 0.10.0
libtpu: 0.0.40
codegen_flags: <defaults>
</compile_context>

<pallas_src>
import functools

import jax
import jax.numpy as jnp
from jax.experimental import pallas as pl
from jax.experimental.pallas import tpu as pltpu


def _round_up(a, b):
    return (a + b - 1) // b * b


def _cdiv(a, b):
    return (a + b - 1) // b


def _fused_shortcut_kernel(x_ref, w0_ref, b0_ref, w1s_ref, b1_ref, o_ref):
    # x_ref: (tm, cin_p) tile; weights are full (padded) arrays resident in VMEM.
    x = x_ref[...]
    h = jnp.maximum(x, 0.0)                                   # relu(x)
    net = jnp.dot(h, w0_ref[...],
                  preferred_element_type=jnp.float32) + b0_ref[...]   # fc_0 (f32 acc)
    dh = jnp.maximum(net, 0.0).astype(x.dtype)                # relu(net), back to MXU dtype
    # Fused fc_1 + shortcut: one matmul with K = size_h_p + size_in_p.
    lhs = jnp.concatenate([dh, x], axis=-1)
    out = jnp.dot(lhs, w1s_ref[...],
                  preferred_element_type=jnp.float32) + b1_ref[...]
    o_ref[...] = out.astype(o_ref.dtype)


def _identity_kernel(x_ref, w0_ref, b0_ref, w1_ref, b1_ref, o_ref):
    x = x_ref[...]
    h = jnp.maximum(x, 0.0)
    net = jnp.dot(h, w0_ref[...],
                  preferred_element_type=jnp.float32) + b0_ref[...]
    dh = jnp.maximum(net, 0.0).astype(x.dtype)
    dx = jnp.dot(dh, w1_ref[...],
                 preferred_element_type=jnp.float32) + b1_ref[...]
    o_ref[...] = (x.astype(jnp.float32) + dx).astype(o_ref.dtype)


@functools.partial(jax.jit, static_argnames=("tm", "compute_dtype"))
def resnet_block_fc(x, params, tm=256, compute_dtype=jnp.float32):
    """Apply ResnetBlockFC to x of shape [N, size_in]; returns [N, size_out]."""
    N, size_in = x.shape
    w0, b0 = params["w0"], params["b0"]        # [size_in, size_h], [size_h]
    w1, b1 = params["w1"], params["b1"]        # [size_h, size_out], [size_out]
    ws = params.get("ws")                      # [size_in, size_out] or None
    size_h = w0.shape[1]
    size_out = w1.shape[1]
    out_dtype = x.dtype
    f32 = jnp.float32

    if ws is None and size_in != size_out:
        raise ValueError("identity shortcut requires size_in == size_out")

    # --- lane-dense channel padding (multiples of 128) -----------------------
    cin_p = _round_up(size_in, 128)
    ch_p = _round_up(size_h, 128)
    cout_p = _round_up(size_out, 128)

    # --- row tiling: big tiles, but keep >= 2 grid steps for v7x's 2 TCs -----
    n_rows = _round_up(N, 8)
    tm_eff = max(8, min(tm, n_rows))
    if n_rows > 8 and _cdiv(n_rows, tm_eff) < 2:
        tm_eff = _round_up(_cdiv(n_rows, 2), 8)
    n_p = _round_up(N, tm_eff)
    grid = (n_p // tm_eff,)

    # --- pad + cast operands (biases stay f32; accumulation is f32) ----------
    xp = jnp.zeros((n_p, cin_p), compute_dtype).at[:N, :size_in].set(
        x.astype(compute_dtype))
    w0p = jnp.zeros((cin_p, ch_p), compute_dtype).at[:size_in, :size_h].set(
        w0.astype(compute_dtype))
    b0p = jnp.zeros((1, ch_p), f32).at[:, :size_h].set(
        b0.astype(f32).reshape(1, size_h))
    b1p = jnp.zeros((1, cout_p), f32).at[:, :size_out].set(
        b1.astype(f32).reshape(1, size_out))

    x_spec = pl.BlockSpec((tm_eff, cin_p), lambda i: (i, 0))
    o_spec = pl.BlockSpec((tm_eff, cout_p), lambda i: (i, 0))
    w0_spec = pl.BlockSpec((cin_p, ch_p), lambda i: (0, 0))
    b0_spec = pl.BlockSpec((1, ch_p), lambda i: (0, 0))
    b1_spec = pl.BlockSpec((1, cout_p), lambda i: (0, 0))

    if ws is not None:
        # Fuse fc_1 weight and shortcut weight along K: [[w1]; [ws]].
        k2 = ch_p + cin_p
        w1s = jnp.zeros((k2, cout_p), compute_dtype)
        w1s = w1s.at[:size_h, :size_out].set(w1.astype(compute_dtype))
        w1s = w1s.at[ch_p:ch_p + size_in, :size_out].set(ws.astype(compute_dtype))
        w_second = w1s
        w1_spec = pl.BlockSpec((k2, cout_p), lambda i: (0, 0))
        kernel = _fused_shortcut_kernel
    else:
        w1p = jnp.zeros((ch_p, cout_p), compute_dtype).at[:size_h, :size_out].set(
            w1.astype(compute_dtype))
        w_second = w1p
        w1_spec = pl.BlockSpec((ch_p, cout_p), lambda i: (0, 0))
        kernel = _identity_kernel

    # --- explicit VMEM budget (double-buffered tiles + resident weights) -----
    bpe = jnp.dtype(compute_dtype).itemsize
    est = (2 * tm_eff * cin_p * bpe                              # x tile (dbl-buf)
           + 2 * tm_eff * cout_p * jnp.dtype(out_dtype).itemsize  # out tile
           + 2 * (cin_p * ch_p + w_second.shape[0] * cout_p) * bpe  # weights
           + 2 * (ch_p + cout_p) * 4                             # biases
           + tm_eff * (ch_p + cin_p + cout_p) * 4)               # f32 temps
    vmem_limit = int(min(max(2 * est, 16 << 20), 64 << 20))
    # TODO(synk): for very large size_h/size_out (>= ~2048) add an output-N grid
    # axis tiling w1s/b1/out so resident weights stay inside v7x's 64 MiB VMEM.

    out_p = pl.pallas_call(
        kernel,
        out_shape=jax.ShapeDtypeStruct((n_p, cout_p), out_dtype),
        grid_spec=pltpu.PrefetchScalarGridSpec(
            num_scalar_prefetch=0,
            grid=grid,
            in_specs=[x_spec, w0_spec, b0_spec, w1_spec, b1_spec],
            out_specs=o_spec,
        ),
        compiler_params=pltpu.CompilerParams(
            dimension_semantics=("parallel",),
            vmem_limit_bytes=vmem_limit,
        ),
    )(xp, w0p, b0p, w_second, b1p)

    return out_p[:N, :size_out]


def init_resnet_block_fc(key, size_in, size_out=None, size_h=None,
                         dtype=jnp.float32):
    """Deterministic synthetic init matching the PyTorch module's shapes."""
    if size_out is None:
        size_out = size_in
    if size_h is None:
        size_h = min(size_in, size_out)
    k0, k1, k2, k3 = jax.random.split(key, 4)
    w0 = jax.random.normal(k0, (size_in, size_h), dtype) * 0.1   # fc_0 (stored [in, out])
    b0 = jax.random.normal(k1, (size_h,), dtype) * 0.1
    w1 = jnp.zeros((size_h, size_out), dtype)                     # zero-init, as in torch
    b1 = jax.random.normal(k2, (size_out,), dtype) * 0.1
    params = {"w0": w0, "b0": b0, "w1": w1, "b1": b1}
    if size_in != size_out:
        params["ws"] = jax.random.normal(k3, (size_in, size_out), dtype) * 0.1
    return params


def resnet_block_fc_ref(x, params):
    """Pure-JAX reference for correctness checking."""
    h = jnp.maximum(x, 0.0)
    net = h @ params["w0"] + params["b0"]
    dx = jnp.maximum(net, 0.0) @ params["w1"] + params["b1"]
    x_s = x @ params["ws"] if "ws" in params else x
    return x_s + dx


if __name__ == "__main__":
    key = jax.random.PRNGKey(0)
    kx, kp, kx2, kp2 = jax.random.split(key, 4)

    # Learned-shortcut case with a row count that is NOT a multiple of the tile.
    N, size_in, size_out = 50, 32, 64
    x = jax.random.normal(kx, (N, size_in), jnp.float32)
    params = init_resnet_block_fc(kp, size_in, size_out)

    out = jax.block_until_ready(resnet_block_fc(x, params))
    ref = resnet_block_fc_ref(x, params)
    assert out.shape == (N, size_out)
    assert jnp.allclose(out, ref, atol=1e-5, rtol=1e-5)

    # bf16 operands (v6e/v7x MXU path); accumulation stays f32 -> looser tolerance.
    out_bf16 = jax.block_until_ready(
        resnet_block_fc(x, params, compute_dtype=jnp.bfloat16))
    assert jnp.allclose(out_bf16, ref, atol=5e-2, rtol=5e-2)

    # Identity-shortcut case (size_in == size_out).
    N2, size2 = 64, 48
    x2 = jax.random.normal(kx2, (N2, size2), jnp.float32)
    params2 = init_resnet_block_fc(kp2, size2)
    out2 = jax.block_until_ready(resnet_block_fc(x2, params2))
    ref2 = resnet_block_fc_ref(x2, params2)
    assert out2.shape == (N2, size2)
    assert jnp.allclose(out2, ref2, atol=1e-5, rtol=1e-5)

    print("KERNEL_OK")
</pallas_src>

<mosaic_0001>
module attributes {stable_mosaic.version = 11 : i64} {
  func.func @_fused_shortcut_kernel(%arg0: i32, %arg1: memref<32x128xf32, #tpu.memory_space<vmem>>, %arg2: memref<128x128xf32, #tpu.memory_space<vmem>>, %arg3: memref<1x128xf32, #tpu.memory_space<vmem>>, %arg4: memref<256x128xf32, #tpu.memory_space<vmem>>, %arg5: memref<1x128xf32, #tpu.memory_space<vmem>>, %arg6: memref<32x128xf32, #tpu.memory_space<vmem>>) attributes {dimension_semantics = [#tpu.dimension_semantics<parallel>], iteration_bounds = array<i64: 2>, scalar_prefetch = 0 : i64, scratch_operands = 0 : i64, tpu.core_type = #tpu.core_type<tc>, window_params = [{transform_indices = @transform_0, window_bounds = array<i64: 32, 128>}, {pipeline_mode = #tpu.pipeline_mode<synchronous>, transform_indices = @transform_1, window_bounds = array<i64: 128, 128>}, {pipeline_mode = #tpu.pipeline_mode<synchronous>, transform_indices = @transform_2, window_bounds = array<i64: 1, 128>}, {pipeline_mode = #tpu.pipeline_mode<synchronous>, transform_indices = @transform_3, window_bounds = array<i64: 256, 128>}, {pipeline_mode = #tpu.pipeline_mode<synchronous>, transform_indices = @transform_4, window_bounds = array<i64: 1, 128>}, {transform_indices = @transform_5, window_bounds = array<i64: 32, 128>}]} {
    %c0 = arith.constant 0 : index
    %c0_0 = arith.constant 0 : index
    %0 = vector.load %arg1[%c0, %c0_0] : memref<32x128xf32, #tpu.memory_space<vmem>>, vector<32x128xf32>
    %cst = arith.constant 0.000000e+00 : f32
    %1 = vector.broadcast %cst : f32 to vector<32x128xf32>
    %2 = arith.maximumf %0, %1 : vector<32x128xf32>
    %c0_1 = arith.constant 0 : index
    %c0_2 = arith.constant 0 : index
    %3 = vector.load %arg2[%c0_1, %c0_2] : memref<128x128xf32, #tpu.memory_space<vmem>>, vector<128x128xf32>
    %cst_3 = arith.constant dense<0.000000e+00> : vector<32x128xf32>
    %4 = tpu.matmul %2, %3, %cst_3 {dimension_numbers = #tpu.dot_dimension_numbers<[1], [0], [0], [1], [0, 0, 1, 1], [], []>} : vector<32x128xf32>, vector<128x128xf32>, vector<32x128xf32> -> vector<32x128xf32>
    %c0_4 = arith.constant 0 : index
    %c0_5 = arith.constant 0 : index
    %5 = vector.load %arg3[%c0_4, %c0_5] : memref<1x128xf32, #tpu.memory_space<vmem>>, vector<1x128xf32>
    %6 = vector.broadcast %5 : vector<1x128xf32> to vector<32x128xf32>
    %7 = arith.addf %4, %6 : vector<32x128xf32>
    %cst_6 = arith.constant 0.000000e+00 : f32
    %8 = vector.broadcast %cst_6 : f32 to vector<32x128xf32>
    %9 = arith.maximumf %7, %8 : vector<32x128xf32>
    %10 = tpu.concatenate %9, %0 in 1 : vector<32x128xf32>, vector<32x128xf32> -> vector<32x256xf32>
    %c0_7 = arith.constant 0 : index
    %c0_8 = arith.constant 0 : index
    %11 = vector.load %arg4[%c0_7, %c0_8] : memref<256x128xf32, #tpu.memory_space<vmem>>, vector<256x128xf32>
    %cst_9 = arith.constant dense<0.000000e+00> : vector<32x128xf32>
    %12 = tpu.matmul %10, %11, %cst_9 {dimension_numbers = #tpu.dot_dimension_numbers<[1], [0], [0], [1], [0, 0, 1, 1], [], []>} : vector<32x256xf32>, vector<256x128xf32>, vector<32x128xf32> -> vector<32x128xf32>
    %c0_10 = arith.constant 0 : index
    %c0_11 = arith.constant 0 : index
    %13 = vector.load %arg5[%c0_10, %c0_11] : memref<1x128xf32, #tpu.memory_space<vmem>>, vector<1x128xf32>
    %14 = vector.broadcast %13 : vector<1x128xf32> to vector<32x128xf32>
    %15 = arith.addf %12, %14 : vector<32x128xf32>
    %c0_12 = arith.constant 0 : index
    %c0_13 = arith.constant 0 : index
    %16 = vector.load %arg6[%c0_12, %c0_13] : memref<32x128xf32, #tpu.memory_space<vmem>>, vector<32x128xf32>
    tpu.vector_store %arg6[%c0_12, %c0_13], %15 {strides = array<i32>} : memref<32x128xf32, #tpu.memory_space<vmem>>, vector<32x128xf32>,
    return
  }
  func.func @transform_0(%arg0: i32) -> (i32, i32) {
    %c0_i32 = arith.constant 0 : i32
    %c0_i32_0 = arith.constant 0 : i32
    return %arg0, %c0_i32 : i32, i32
  }
  func.func @transform_1(%arg0: i32) -> (i32, i32) {
    %c0_i32 = arith.constant 0 : i32
    %c0_i32_0 = arith.constant 0 : i32
    %c0_i32_1 = arith.constant 0 : i32
    return %c0_i32, %c0_i32_0 : i32, i32
  }
  func.func @transform_2(%arg0: i32) -> (i32, i32) {
    %c0_i32 = arith.constant 0 : i32
    %c0_i32_0 = arith.constant 0 : i32
    %c0_i32_1 = arith.constant 0 : i32
    return %c0_i32, %c0_i32_0 : i32, i32
  }
  func.func @transform_3(%arg0: i32) -> (i32, i32) {
    %c0_i32 = arith.constant 0 : i32
    %c0_i32_0 = arith.constant 0 : i32
    %c0_i32_1 = arith.constant 0 : i32
    return %c0_i32, %c0_i32_0 : i32, i32
  }
  func.func @transform_4(%arg0: i32) -> (i32, i32) {
    %c0_i32 = arith.constant 0 : i32
    %c0_i32_0 = arith.constant 0 : i32
    %c0_i32_1 = arith.constant 0 : i32
    return %c0_i32, %c0_i32_0 : i32, i32
  }
  func.func @transform_5(%arg0: i32) -> (i32, i32) {
    %c0_i32 = arith.constant 0 : i32
    %c0_i32_0 = arith.constant 0 : i32
    return %arg0, %c0_i32 : i32, i32
  }
}

</mosaic_0001>

<bundles_post_ra>
// kernel: resnet_block_fc.1
= control target key start
LH: loop header
LB: loop body
LE: loop exit
PB: predicated region body
PF: predicated region fallthrough
CT: control target
= control target key end

     0   :  { %s693_s18 = smov 0   ;;  %s877_s0 = inlined_call_operand.vmem [shape: f32[64,128], index: 0, kind: input, shape index: {}]   ;;  %s878_s1 = inlined_call_operand.vmem [shape: f32[128,128], index: 1, kind: input, shape index: {}]   ;;  %s879_s2 = inlined_call_operand.vmem [shape: f32[1,128], index: 2, kind: input, shape index: {}]   ;;  %s880_s3 = inlined_call_operand.vmem [shape: f32[256,128], index: 3, kind: input, shape index: {}]   ;;  %s881_s4 = inlined_call_operand.vmem [shape: f32[1,128], index: 4, kind: input, shape index: {}]   ;;  %s882_s5 = inlined_call_operand.vmem [shape: f32[64,128], index: 5, kind: output, shape index: {}]  }
   0x1 LB: > { %s532_s19 = sadd.s32 4294967295, %s661_s18   ;;  %p536_p0 = scmp.ge.s32.totalorder %s661_s18, 1  ;;  %s661_s18 = sphi %s693_s18, %s15_s18  }
   0x2   : > { %p188_p1 = scmp.lt.s32.totalorder %s661_s18, 3 }
   0x4   : > { %p189_p2 = pnand %p536_p0, %p188_p1 }
   0x5   : > { %s537_s24 = sshll.u32 (!%p189_p2), %s532_s19, 2 }
   0x6   : > { %192 = sbr.rel (%p189_p2) target bundleno = 455 (0x1c7), region = 40  ;;  %p217_p3 = scmp.lt.s32.totalorder (!%p189_p2), %s537_s24, 7 }
   0xb   : > { %v251_v0 = vld [vmem:[%s878_s1 + $0x78] sm:$0xff]  ;;  %v250_v1 = vld [vmem:[%s878_s1 + $0x70] sm:$0xff]  ;;  %v249_v2 = vld [vmem:[%s878_s1 + $0x68] sm:$0xff]  ;;  %s884_s24 = smov (!%p217_p3, %s537_s24), 7 }
   0xc   : > { %609 = vmatprep.subr.mxu0 %v251_v0  ;;  %v248_v3 = vld [vmem:[%s878_s1 + $0x60] sm:$0xff]  ;;  %s538_s29 = sshll.u32 %s884_s24, 3  ;;  %v379_v4 = vld [vmem:[%s880_s3 + $0xf8] sm:$0xff]  ;;  %v378_v7 = vld [vmem:[%s880_s3 + $0xf0] sm:$0xff] }
   0xd   : > { %610 = vmatpush3.msra.mxu0 %v251_v0  ;;  %v363_v5 = vld [vmem:[%s880_s3 + $0x78] sm:$0xff]  ;;  %s730_s13 = scalar_lea.vmem %s877_s0, %s538_s29  ;;  %565 = vmatprep.subr.mxu1 %v379_v4  ;;  %v362_v8 = vld [vmem:[%s880_s3 + $0x70] sm:$0xff]  ;;  %v377_v12 = vld [vmem:[%s880_s3 + $0xe8] sm:$0xff]  ;;  %s226_s17 = scalar_lea.vmem %s882_s5, %s538_s29 }
   0xe   : > { %611 = vmatprep.subr.mxu0 %v250_v1  ;;  %v247_v6 = vld [vmem:[%s878_s1 + $0x58] sm:$0xff]  ;;  %v739_v9 = vld [vmem:[%s730_s13] sm:$0xff]  ;;  %566 = vmatpush3.msra.mxu1 %v363_v5  ;;  %v246_v10 = vld [vmem:[%s878_s1 + $0x50] sm:$0xff] }
   0xf   : > { %612 = vmatpush3.msra.mxu0 %v250_v1  ;;  %v232_v11 = vmax.f32 %v739_v9, 0.0  ;;  %567 = vmatprep.subr.mxu1 %v378_v7  ;;  %v361_v13 = vld [vmem:[%s880_s3 + $0x68] sm:$0xff]  ;;  %v376_v15 = vld [vmem:[%s880_s3 + $0xe0] sm:$0xff]  ;;  %v375_v18 = vld [vmem:[%s880_s3 + $0xd8] sm:$0xff] }
  0x10   : > { %613 = vmatprep.subr.mxu0 %v249_v2  ;;  %568 = vmatpush3.msra.mxu1 %v362_v8  ;;  %v245_v14 = vld [vmem:[%s878_s1 + $0x48] sm:$0xff]  ;;  %v360_v16 = vld [vmem:[%s880_s3 + $0x60] sm:$0xff]  ;;  %v359_v19 = vld [vmem:[%s880_s3 + $0x58] sm:$0xff] }
  0x11   : > { %614 = vmatpush3.msra.mxu0 %v249_v2  ;;  %641 = vmatprep.mubr.f32.mxu0 %v232_v11  ;;  %v244_v17 = vld [vmem:[%s878_s1 + $0x40] sm:$0xff]  ;;  %v243_v20 = vld [vmem:[%s878_s1 + $0x38] sm:$0xff]  ;;  %v374_v21 = vld [vmem:[%s880_s3 + $0xd0] sm:$0xff] }
  0x12   : > { %615 = vmatprep.subr.mxu0 %v248_v3  ;;  %569 = vmatprep.subr.mxu1 %v377_v12  ;;  %v358_v22 = vld [vmem:[%s880_s3 + $0x50] sm:$0xff]  ;;  %v373_v24 = vld [vmem:[%s880_s3 + $0xc8] sm:$0xff]  ;;  %v372_v27 = vld [vmem:[%s880_s3 + $0xc0] sm:$0xff] }
  0x13   : > { %616 = vmatpush3.msra.mxu0 %v248_v3  ;;  %570 = vmatpush3.msra.mxu1 %v361_v13  ;;  %v242_v23 = vld [vmem:[%s878_s1 + $0x30] sm:$0xff]  ;;  %v357_v25 = vld [vmem:[%s880_s3 + $0x48] sm:$0xff]  ;;  %v356_v28 = vld [vmem:[%s880_s3 + $0x40] sm:$0xff] }
  0x14   : > { %617 = vmatprep.subr.mxu0 %v247_v6  ;;  %571 = vmatprep.subr.mxu1 %v376_v15  ;;  %v241_v26 = vld [vmem:[%s878_s1 + $0x28] sm:$0xff]  ;;  %v240_v29 = vld [vmem:[%s878_s1 + $0x20] sm:$0xff]  ;;  %v371_v30 = vld [vmem:[%s880_s3 + $0xb8] sm:$0xff] }
  0x15   : > { %618 = vmatpush3.msra.mxu0 %v247_v6  ;;  %572 = vmatpush3.msra.mxu1 %v360_v16  ;;  %v355_v31 = vld [vmem:[%s880_s3 + $0x38] sm:$0xff]  ;;  %v370_v33 = vld [vmem:[%s880_s3 + $0xb0] sm:$0xff]  ;;  %v369_v36 = vld [vmem:[%s880_s3 + $0xa8] sm:$0xff] }
  0x16   : > { %619 = vmatprep.subr.mxu0 %v246_v10  ;;  %573 = vmatprep.subr.mxu1 %v375_v18  ;;  %v239_v32 = vld [vmem:[%s878_s1 + $0x18] sm:$0xff]  ;;  %v354_v34 = vld [vmem:[%s880_s3 + $0x30] sm:$0xff]  ;;  %v353_v37 = vld [vmem:[%s880_s3 + $0x28] sm:$0xff] }
  0x17   : > { %620 = vmatpush3.msra.mxu0 %v246_v10  ;;  %574 = vmatpush3.msra.mxu1 %v359_v19  ;;  %v238_v35 = vld [vmem:[%s878_s1 + $0x10] sm:$0xff]  ;;  %v237_v38 = vld [vmem:[%s878_s1 + $0x8] sm:$0xff]  ;;  %v368_v40 = vld [vmem:[%s880_s3 + $0xa0] sm:$0xff] }
  0x18   : > { %621 = vmatprep.subr.mxu0 %v245_v14  ;;  %575 = vmatprep.subr.mxu1 %v374_v21  ;;  %v229_v39 = vld [vmem:[%s730_s13 + $0x8] sm:$0xff]  ;;  %v230_v41 = vld [vmem:[%s730_s13 + $0x10] sm:$0xff]  ;;  %v352_v42 = vld [vmem:[%s880_s3 + $0x20] sm:$0xff] }
  0x19   : > { %622 = vmatpush3.msra.mxu0 %v245_v14  ;;  %576 = vmatpush3.msra.mxu1 %v358_v22  ;;  %v236_v43 = vld [vmem:[%s878_s1] sm:$0xff]  ;;  %v367_v44 = vld [vmem:[%s880_s3 + $0x98] sm:$0xff]  ;;  %v233_v45 = vmax.f32 %v229_v39, 0.0  ;;  %v234_v46 = vmax.f32 %v230_v41, 0.0  ;;  %v366_v50 = vld [vmem:[%s880_s3 + $0x90] sm:$0xff] }
  0x1a   : > { %623 = vmatprep.subr.mxu0 %v244_v17  ;;  %577 = vmatprep.subr.mxu1 %v373_v24  ;;  %v231_v47 = vld [vmem:[%s730_s13 + $0x18] sm:$0xff]  ;;  %v350_v51 = vld [vmem:[%s880_s3 + $0x10] sm:$0xff]  ;;  %v365_v52 = vld [vmem:[%s880_s3 + $0x88] sm:$0xff] }
  0x1b   : > { %624 = vmatpush3.msra.mxu0 %v244_v17  ;;  %578 = vmatpush3.msra.mxu1 %v357_v25  ;;  %v235_v48 = vmax.f32 %v231_v47, 0.0  ;;  %v351_v49 = vld [vmem:[%s880_s3 + $0x18] sm:$0xff]  ;;  %v349_v53 = vld [vmem:[%s880_s3 + $0x8] sm:$0xff]  ;;  %v364_v54 = vld [vmem:[%s880_s3 + $0x80] sm:$0xff] }
  0x1c   : > { %625 = vmatprep.subr.mxu0 %v243_v20  ;;  %579 = vmatprep.subr.mxu1 %v372_v27  ;;  %v348_v55 = vld [vmem:[%s880_s3] sm:$0xff] }
  0x1d   : > { %626 = vmatpush3.msra.mxu0 %v243_v20  ;;  %580 = vmatpush3.msra.mxu1 %v356_v28  ;;  %v541_v57 = vld [vmem:[%s879_s2] ss:$0 sm:$0xff] }
  0x1e   : > { %627 = vmatprep.subr.mxu0 %v242_v23  ;;  %581 = vmatprep.subr.mxu1 %v371_v30  ;;  %v542_v6 = vld [vmem:[%s881_s4] ss:$0 sm:$0xff] }
  0x1f   : > { %628 = vmatpush3.msra.mxu0 %v242_v23  ;;  %582 = vmatpush3.msra.mxu1 %v355_v31 }
  0x20   : > { %629 = vmatprep.subr.mxu0 %v241_v26  ;;  %583 = vmatprep.subr.mxu1 %v370_v33 }
  0x21   : > { %630 = vmatpush3.msra.mxu0 %v241_v26  ;;  %584 = vmatpush3.msra.mxu1 %v354_v34 }
  0x22   : > { %631 = vmatprep.subr.mxu0 %v240_v29  ;;  %585 = vmatprep.subr.mxu1 %v369_v36 }
  0x23   : > { %632 = vmatpush3.msra.mxu0 %v240_v29  ;;  %586 = vmatpush3.msra.mxu1 %v353_v37 }
  0x24   : > { %633 = vmatprep.subr.mxu0 %v239_v32  ;;  %587 = vmatprep.subr.mxu1 %v368_v40 }
  0x25   : > { %634 = vmatpush3.msra.mxu0 %v239_v32  ;;  %588 = vmatpush3.msra.mxu1 %v352_v42 }
  0x26   : > { %635 = vmatprep.subr.mxu0 %v238_v35  ;;  %589 = vmatprep.subr.mxu1 %v367_v44 }
  0x27   : > { %636 = vmatpush3.msra.mxu0 %v238_v35  ;;  %451 = vmatprep.mubr.f32.mxu1 %v739_v9 }
  0x28   : > { %637 = vmatprep.subr.mxu0 %v237_v38  ;;  %590 = vmatpush3.msra.mxu1 %v351_v49 }
  0x29   : > { %638 = vmatpush3.msra.mxu0 %v237_v38  ;;  %591 = vmatprep.subr.mxu1 %v366_v50 }
  0x2a   : > { %639 = vmatprep.subr.mxu0 %v236_v43  ;;  %592 = vmatpush3.msra.mxu1 %v350_v51 }
  0x2b   : > { %640 = vmatpush3.msra.mxu0 %v236_v43  ;;  %593 = vmatprep.subr.mxu1 %v365_v52 }
  0x2c   : > { %642 = vmatmul.mubr.f32.vlgmr.msra.gmra.mxu0 %v233_v45  ;;  %594 = vmatpush3.msra.mxu1 %v349_v53 }
  0x2d   : > { %644 = vmatprep.mubr.f32.mxu0 %v234_v46  ;;  %595 = vmatprep.subr.mxu1 %v364_v54 }
  0x2e   : > { %596 = vmatpush3.msra.mxu1 %v348_v55 }
  0x30   : > { %645 = vmatmul.mubr.f32.gmra.mxu0 %v235_v48 }
  0xec   : > { %v643_v56 = vpop.f32.mrf.mxu0 }
  0xed   : > { %v331_v61 = vadd.f32 %v643_v56, %v541_v57 }
  0xee   : > { %v325_v58 = vpop.f32.mrf.mxu0 }
  0xef   : > { %v326_v59 = vadd.f32 %v541_v57, %v325_v58  ;;  %v345_v0 = vmax.f32 %v331_v61, 0.0 }
  0xf0   : > { %v646_v60 = vpop.f32.mrf.mxu0 }
  0xf1   : > { %v344_v62 = vmax.f32 %v326_v59, 0.0  ;;  %v341_v2 = vadd.f32 %v646_v60, %v541_v57 }
  0xf2   : > { %v335_v63 = vpop.f32.mrf.mxu0 }
  0xf3   : > { %452 = vmatmul.mubr.f32.vlgmr.msra.gmra.mxu1 %v344_v62  ;;  %v336_v1 = vadd.f32 %v541_v57, %v335_v63  ;;  %v347_v4 = vmax.f32 %v341_v2, 0.0 }
  0xf4   : > { %456 = vmatprep.mubr.f32.mxu1 %v229_v39 }
  0xf5   : > { %v346_v3 = vmax.f32 %v336_v1, 0.0 }
  0xf7   : > { %457 = vmatmul.mubr.f32.gmra.mxu1 %v345_v0 }
  0xf8   : > { %461 = vmatprep.mubr.f32.mxu1 %v230_v41 }
  0xfb   : > { %462 = vmatmul.mubr.f32.gmra.mxu1 %v346_v3 }
  0xfc   : > { %466 = vmatprep.mubr.f32.mxu1 %v231_v47 }
  0xff   : > { %467 = vmatmul.mubr.f32.gmra.mxu1 %v347_v4 }
 0x1b3   : > { %v597_v5 = vpop.f32.mrf.mxu1 }
 0x1b5   : > { %v598_v7 = vpop.f32.mrf.mxu1 }
 0x1b6   : > { %v599_v8 = vadd.f32 %v598_v7, %v597_v5 }
 0x1b7   : > { %v600_v9 = vpop.f32.mrf.mxu1 }
 0x1b8   : > { %v454_v10 = vadd.f32 %v599_v8, %v542_v6 }
 0x1b9   : > { %v601_v11 = vpop.f32.mrf.mxu1 }
 0x1ba   : > { %472 = vst [vmem:[%s226_s17] sm:$0xff] %v454_v10  ;;  %v602_v12 = vadd.f32 %v601_v11, %v600_v9 }
 0x1bb   : > { %v603_v13 = vpop.f32.mrf.mxu1 }
 0x1bc   : > { %v459_v14 = vadd.f32 %v602_v12, %v542_v6 }
 0x1bd   : > { %v604_v15 = vpop.f32.mrf.mxu1 }
 0x1be   : > { %473 = vst [vmem:[%s226_s17 + $0x8] sm:$0xff] %v459_v14  ;;  %v605_v16 = vadd.f32 %v604_v15, %v603_v13 }
 0x1bf   : > { %v606_v17 = vpop.f32.mrf.mxu1 }
 0x1c0   : > { %v464_v18 = vadd.f32 %v605_v16, %v542_v6 }
 0x1c1   : > { %v607_v19 = vpop.f32.mrf.mxu1 }
 0x1c2   : > { %474 = vst [vmem:[%s226_s17 + $0x10] sm:$0xff] %v464_v18  ;;  %v608_v20 = vadd.f32 %v607_v19, %v606_v17 }
 0x1c4   : > { %v469_v21 = vadd.f32 %v608_v20, %v542_v6 }
 0x1c6   : > { %475 = vst [vmem:[%s226_s17 + $0x18] sm:$0xff] %v469_v21 }
 0x1c7 PF: > { %s15_s18 = sadd.s32 1, %s661_s18  }
 0x1c8   : > { %p12_p4 = scmp.ge.s32.totalorder %s15_s18, 4  }
 0x1ca   :  { %14 = sbr.rel (!%p12_p4) target bundleno = 1 (0x1), region = 70 }

</bundles_post_ra>
